<compile_context>
chip_gen: v7x
topology: tpu7x:2x2x1
jax: 0.10.0
libtpu: 0.0.40
codegen_flags: <defaults>
</compile_context>

<pallas_src>
import math

import jax
import jax.numpy as jnp
from jax import lax
from jax.experimental import pallas as pl
from jax.experimental.pallas import tpu as pltpu


def _pick_tile(n, max_tile=256):
    """Largest power-of-two tile <= max_tile that divides n (fallback: n)."""
    t = max_tile
    while t >= 8:
        if n % t == 0:
            return t
        t //= 2
    return n


# ----------------------------------------------------------------------------
# Kernel 1: patch embedding with fused normalization
#   out = (2*x/255 - 1) @ w  ==  x @ (w * 2/255) + (-sum_p w[p, :])
#   patches (M, P) bf16  @  w (P, C) bf16  + bias (1, C) f32  ->  (M, C) bf16
# ----------------------------------------------------------------------------
def _patch_embed_kernel(p_ref, w_ref, b_ref, o_ref):
    acc = jnp.dot(p_ref[...], w_ref[...], preferred_element_type=jnp.float32)
    o_ref[...] = (acc + b_ref[...]).astype(o_ref.dtype)


def patch_embed(patches, w, bias):
    M, P = patches.shape
    C = w.shape[1]
    tm = _pick_tile(M, max_tile=512)
    return pl.pallas_call(
        _patch_embed_kernel,
        out_shape=jax.ShapeDtypeStruct((M, C), jnp.bfloat16),
        grid=(M // tm,),
        in_specs=[
            pl.BlockSpec((tm, P), lambda i: (i, 0)),
            pl.BlockSpec((P, C), lambda i: (0, 0)),      # weight stays resident
            pl.BlockSpec((1, C), lambda i: (0, 0)),
        ],
        out_specs=pl.BlockSpec((tm, C), lambda i: (i, 0)),
        compiler_params=pltpu.CompilerParams(dimension_semantics=("parallel",)),
    )(patches, w, bias)


# ----------------------------------------------------------------------------
# Kernel 2: fused correlation + streaming top-k (forward and backward).
#   S = f1 @ f2^T computed per (tm, tn) tile (bf16 MXU, f32 accumulate).
#   Row-wise running top-k (forward) kept in the (B, N1, k) output blocks,
#   column-wise running top-k (backward, = top-k of S^T) kept resident in the
#   (B, N2, k) output blocks across the whole per-batch grid.
# ----------------------------------------------------------------------------
def _topk_merge(run_v, run_i, s, s_idx, k):
    """Merge running top-k (R, k) with new candidates (R, T); returns sorted
    descending top-k values/indices, ties broken toward smaller index."""
    cand_v = jnp.concatenate([run_v, s], axis=1)          # (R, k+T)
    cand_i = jnp.concatenate([run_i, s_idx], axis=1)
    big = jnp.int32(2 ** 30)
    out_v, out_i = [], []
    for _ in range(k):
        m = jnp.max(cand_v, axis=1, keepdims=True)                       # (R, 1)
        is_max = cand_v == m
        sel = jnp.min(jnp.where(is_max, cand_i, big), axis=1, keepdims=True)
        out_v.append(m)
        out_i.append(sel)
        cand_v = jnp.where(is_max & (cand_i == sel), -jnp.inf, cand_v)
    return jnp.concatenate(out_v, axis=1), jnp.concatenate(out_i, axis=1)


def _make_corr_topk_kernel(k, tm, tn, bidir):
    def kernel(f1_ref, f2_ref, fv_ref, fi_ref, *bwd_refs):
        i = pl.program_id(1)     # N1 tile
        j = pl.program_id(2)     # N2 tile (innermost, 'arbitrary')

        @pl.when(j == 0)
        def _init_fwd():
            fv_ref[...] = jnp.full(fv_ref.shape, -jnp.inf, dtype=fv_ref.dtype)
            fi_ref[...] = jnp.zeros(fi_ref.shape, dtype=fi_ref.dtype)

        f1 = f1_ref[0]           # (tm, C) bf16
        f2 = f2_ref[0]           # (tn, C) bf16
        s = lax.dot_general(f1, f2,
                            dimension_numbers=(((1,), (1,)), ((), ())),
                            preferred_element_type=jnp.float32)          # (tm, tn)

        col = lax.broadcasted_iota(jnp.int32, (tm, tn), 1) + j * tn
        fv, fi = _topk_merge(fv_ref[0], fi_ref[0], s, col, k)
        fv_ref[0] = fv
        fi_ref[0] = fi

        if bidir:
            bv_ref, bi_ref = bwd_refs

            @pl.when((i == 0) & (j == 0))
            def _init_bwd():
                bv_ref[...] = jnp.full(bv_ref.shape, -jnp.inf, dtype=bv_ref.dtype)
                bi_ref[...] = jnp.zeros(bi_ref.shape, dtype=bi_ref.dtype)

            st = s.T                                                     # (tn, tm)
            row = lax.broadcasted_iota(jnp.int32, (tn, tm), 1) + i * tm
            off = pl.multiple_of(j * tn, tn)
            bv_old = bv_ref[0, pl.ds(off, tn), :]
            bi_old = bi_ref[0, pl.ds(off, tn), :]
            bv, bi = _topk_merge(bv_old, bi_old, st, row, k)
            bv_ref[0, pl.ds(off, tn), :] = bv
            bi_ref[0, pl.ds(off, tn), :] = bi

    return kernel


def corr_topk_pallas(f1, f2, k, bidir=True):
    """f1 (B, N1, C), f2 (B, N2, C) -> ((fwd_vals, fwd_idx), (bwd_vals, bwd_idx) | None).
    fwd_*: (B, N1, k); bwd_*: (B, N2, k); values are un-scaled dot products."""
    f1 = f1.astype(jnp.bfloat16)
    f2 = f2.astype(jnp.bfloat16)
    B, N1, C = f1.shape
    N2 = f2.shape[1]
    assert k <= N2 and (not bidir or k <= N1)
    tm = _pick_tile(N1)
    tn = _pick_tile(N2)

    out_shape = [jax.ShapeDtypeStruct((B, N1, k), jnp.float32),
                 jax.ShapeDtypeStruct((B, N1, k), jnp.int32)]
    out_specs = [pl.BlockSpec((1, tm, k), lambda b, i, j: (b, i, 0)),
                 pl.BlockSpec((1, tm, k), lambda b, i, j: (b, i, 0))]
    if bidir:
        out_shape += [jax.ShapeDtypeStruct((B, N2, k), jnp.float32),
                      jax.ShapeDtypeStruct((B, N2, k), jnp.int32)]
        out_specs += [pl.BlockSpec((1, N2, k), lambda b, i, j: (b, 0, 0)),
                      pl.BlockSpec((1, N2, k), lambda b, i, j: (b, 0, 0))]

    outs = pl.pallas_call(
        _make_corr_topk_kernel(k=k, tm=tm, tn=tn, bidir=bidir),
        out_shape=tuple(out_shape),
        grid=(B, N1 // tm, N2 // tn),
        in_specs=[pl.BlockSpec((1, tm, C), lambda b, i, j: (b, i, 0)),
                  pl.BlockSpec((1, tn, C), lambda b, i, j: (b, j, 0))],
        out_specs=tuple(out_specs),
        compiler_params=pltpu.CompilerParams(
            dimension_semantics=("parallel", "arbitrary", "arbitrary")),
    )(f1, f2)

    if bidir:
        fv, fi, bv, bi = outs
        return (fv, fi), (bv, bi)
    fv, fi = outs
    return (fv, fi), None


# ----------------------------------------------------------------------------
# compute_sparse_corr — same output semantics as the PyTorch reference.
# ----------------------------------------------------------------------------
def _package_sparse_corr(vals_nk, idx_nk, H2, W2, C):
    """vals/idx (B, N1, k) -> (corr (B,k,N1), coords0, coords1, batch_index)."""
    B, N1, k = vals_nk.shape
    inv_sqrt_c = 1.0 / math.sqrt(float(C))
    corr = jnp.transpose(vals_nk, (0, 2, 1)) * inv_sqrt_c           # (B, k, N1)
    indices = jnp.transpose(idx_nk, (0, 2, 1))                      # (B, k, N1)

    # coords_grid_y_first: channel 0 = y, channel 1 = x.
    gy, gx = jnp.meshgrid(jnp.arange(H2, dtype=jnp.float32),
                          jnp.arange(W2, dtype=jnp.float32), indexing="ij")
    coords = jnp.stack([gy.reshape(-1), gx.reshape(-1)], axis=0)    # (2, N2)
    coords0 = jnp.broadcast_to(coords[None, :, None, :], (B, 2, k, N1))
    coords1_abs = jnp.transpose(coords[:, indices], (1, 0, 2, 3))   # (B, 2, k, N1)
    coords1 = coords1_abs - coords0
    batch_index = jnp.broadcast_to(
        jnp.arange(B, dtype=jnp.float32).reshape(B, 1, 1, 1), (B, 1, k, N1))
    return corr, coords0, coords1, batch_index


def compute_sparse_corr_pallas(fmap1_nc, fmap2_nc, H2, W2, k=32):
    """Single-direction API matching the PyTorch compute_sparse_corr."""
    C = fmap1_nc.shape[-1]
    (fv, fi), _ = corr_topk_pallas(fmap1_nc, fmap2_nc, k, bidir=False)
    return _package_sparse_corr(fv, fi, H2, W2, C)


# ----------------------------------------------------------------------------
# SparseNet wrapper (forward-pass skeleton; see TODO(synk) at top of file)
# ----------------------------------------------------------------------------
class SparseNetPallas:
    def __init__(self, num_k=8, feat_dim=128, seed=0):
        self.num_k = num_k
        self.feat_dim = feat_dim
        key = jax.random.PRNGKey(seed)
        w = (jax.random.normal(key, (3 * 4 * 4, feat_dim), jnp.float32)
             * (1.0 / math.sqrt(3 * 4 * 4)))
        # Fold 2*(x/255) - 1 into the projection:
        #   (2/255 * x - 1) @ w = x @ (2/255 * w) + (-sum_p w[p, :])
        self.w_eff = (w * (2.0 / 255.0)).astype(jnp.bfloat16)
        self.b_eff = (-jnp.sum(w, axis=0, keepdims=True)).astype(jnp.float32)

    def _fnet(self, imgs):
        # imgs: raw un-normalized (BB, 3, H, W) -> features (BB, N, C), N = (H//4)*(W//4)
        BB, Cin, H, W = imgs.shape
        h, w = H // 4, W // 4
        p = imgs.reshape(BB, Cin, h, 4, w, 4)
        p = jnp.transpose(p, (0, 2, 4, 1, 3, 5)).reshape(BB * h * w, Cin * 16)
        feats = patch_embed(p.astype(jnp.bfloat16), self.w_eff, self.b_eff)
        return feats.reshape(BB, h * w, self.feat_dim)

    def __call__(self, images, fwd_bwd=True, suffix=""):
        # images: (B, 2, 3, H, W) in [0, 255]
        B, two, Cin, H, W = images.shape
        assert two == 2 and Cin == 3
        h, w = H // 4, W // 4

        fmaps = self._fnet(images.reshape(B * two, Cin, H, W))
        fmaps = fmaps.reshape(B, two, h * w, self.feat_dim)           # (B, 2, N, C) bf16
        fmap1, fmap2 = fmaps[:, 0], fmaps[:, 1]

        outputs = {}
        # Forward and backward directions share a single matmul pass:
        # the backward correlation matrix is exactly S^T.
        (fv, fi), bwd = corr_topk_pallas(fmap1, fmap2, self.num_k, bidir=fwd_bwd)
        outputs["sparse_corr_f" + suffix] = _package_sparse_corr(
            fv, fi, h, w, self.feat_dim)
        if fwd_bwd:
            bv, bi = bwd
            outputs["sparse_corr_b" + suffix] = _package_sparse_corr(
                bv, bi, h, w, self.feat_dim)
        # TODO(synk): cnet / update_block / sparse cost-volume pyramid / convex
        # upsampling refinement loop omitted — submodules undefined in the
        # provided reference source.
        return outputs


# ----------------------------------------------------------------------------
if __name__ == "__main__":
    key = jax.random.PRNGKey(0)
    B, H, W = 2, 32, 32
    k = 8
    feat_dim = 128

    images = jax.random.uniform(key, (B, 2, 3, H, W), jnp.float32, 0.0, 255.0)

    net = SparseNetPallas(num_k=k, feat_dim=feat_dim, seed=0)
    out = net(images, fwd_bwd=True)
    jax.block_until_ready(out)

    # Correctness check of the fused corr + streaming top-k kernel against a
    # pure-JAX reference (same bf16-rounded inputs, f32 accumulation).
    k1, k2 = jax.random.split(key)
    N = (H // 4) * (W // 4)
    f1 = jax.random.normal(k1, (B, N, feat_dim), jnp.float32)
    f2 = jax.random.normal(k2, (B, N, feat_dim), jnp.float32)

    (fv, fi), (bv, bi) = corr_topk_pallas(f1, f2, k, bidir=True)
    jax.block_until_ready((fv, fi, bv, bi))

    f1r = f1.astype(jnp.bfloat16).astype(jnp.float32)
    f2r = f2.astype(jnp.bfloat16).astype(jnp.float32)
    S_ref = jnp.einsum("bnc,bmc->bnm", f1r, f2r)                  # (B, N, N)
    St_ref = jnp.swapaxes(S_ref, 1, 2)
    vf_ref, _ = lax.top_k(S_ref, k)
    vb_ref, _ = lax.top_k(St_ref, k)

    assert fv.shape == (B, N, k) and fi.shape == (B, N, k)
    assert bv.shape == (B, N, k) and bi.shape == (B, N, k)
    assert jnp.allclose(fv, vf_ref, atol=1e-2, rtol=1e-3), "fwd top-k values mismatch"
    assert jnp.allclose(bv, vb_ref, atol=1e-2, rtol=1e-3), "bwd top-k values mismatch"
    # Indices must point at the selected values (tie-robust check).
    g_f = jnp.take_along_axis(S_ref, fi, axis=2)
    g_b = jnp.take_along_axis(St_ref, bi, axis=2)
    assert jnp.allclose(g_f, fv, atol=1e-2, rtol=1e-3), "fwd top-k indices mismatch"
    assert jnp.allclose(g_b, bv, atol=1e-2, rtol=1e-3), "bwd top-k indices mismatch"

    # Packaged outputs keep the PyTorch shapes.
    corr_f, c0, c1, bidx = out["sparse_corr_f"]
    assert corr_f.shape == (B, k, N)
    assert c0.shape == (B, 2, k, N) and c1.shape == (B, 2, k, N)
    assert bidx.shape == (B, 1, k, N)
    corr_b = out["sparse_corr_b"][0]
    assert corr_b.shape == (B, k, N)

    print("KERNEL_OK")
</pallas_src>

<mosaic_0001>
module attributes {stable_mosaic.version = 11 : i64} {
  func.func @_patch_embed_kernel(%arg0: i32, %arg1: memref<256x48xbf16, #tpu.memory_space<vmem>>, %arg2: memref<48x128xbf16, #tpu.memory_space<vmem>>, %arg3: memref<1x128xf32, #tpu.memory_space<vmem>>, %arg4: memref<256x128xbf16, #tpu.memory_space<vmem>>) attributes {dimension_semantics = [#tpu.dimension_semantics<parallel>], iteration_bounds = array<i64: 1>, scalar_prefetch = 0 : i64, scratch_operands = 0 : i64, tpu.core_type = #tpu.core_type<tc>, window_params = [{transform_indices = @transform_0, window_bounds = array<i64: 256, 48>}, {pipeline_mode = #tpu.pipeline_mode<synchronous>, transform_indices = @transform_1, window_bounds = array<i64: 48, 128>}, {pipeline_mode = #tpu.pipeline_mode<synchronous>, transform_indices = @transform_2, window_bounds = array<i64: 1, 128>}, {transform_indices = @transform_3, window_bounds = array<i64: 256, 128>}]} {
    %c0 = arith.constant 0 : index
    %c0_0 = arith.constant 0 : index
    %0 = vector.load %arg1[%c0, %c0_0] : memref<256x48xbf16, #tpu.memory_space<vmem>>, vector<256x48xbf16>
    %c0_1 = arith.constant 0 : index
    %c0_2 = arith.constant 0 : index
    %1 = vector.load %arg2[%c0_1, %c0_2] : memref<48x128xbf16, #tpu.memory_space<vmem>>, vector<48x128xbf16>
    %cst = arith.constant dense<0.000000e+00> : vector<256x128xf32>
    %2 = tpu.matmul %0, %1, %cst {dimension_numbers = #tpu.dot_dimension_numbers<[1], [0], [0], [1], [0, 0, 1, 1], [], []>} : vector<256x48xbf16>, vector<48x128xbf16>, vector<256x128xf32> -> vector<256x128xf32>
    %c0_3 = arith.constant 0 : index
    %c0_4 = arith.constant 0 : index
    %3 = vector.load %arg3[%c0_3, %c0_4] : memref<1x128xf32, #tpu.memory_space<vmem>>, vector<1x128xf32>
    %4 = vector.broadcast %3 : vector<1x128xf32> to vector<256x128xf32>
    %5 = arith.addf %2, %4 : vector<256x128xf32>
    %6 = arith.truncf %5 : vector<256x128xf32> to vector<256x128xbf16>
    %c0_5 = arith.constant 0 : index
    %c0_6 = arith.constant 0 : index
    %7 = vector.load %arg4[%c0_5, %c0_6] : memref<256x128xbf16, #tpu.memory_space<vmem>>, vector<256x128xbf16>
    tpu.vector_store %arg4[%c0_5, %c0_6], %6 {strides = array<i32>} : memref<256x128xbf16, #tpu.memory_space<vmem>>, vector<256x128xbf16>,
    return
  }
  func.func @transform_0(%arg0: i32) -> (i32, i32) {
    %c0_i32 = arith.constant 0 : i32
    %c0_i32_0 = arith.constant 0 : i32
    return %arg0, %c0_i32 : i32, i32
  }
  func.func @transform_1(%arg0: i32) -> (i32, i32) {
    %c0_i32 = arith.constant 0 : i32
    %c0_i32_0 = arith.constant 0 : i32
    %c0_i32_1 = arith.constant 0 : i32
    return %c0_i32, %c0_i32_0 : i32, i32
  }
  func.func @transform_2(%arg0: i32) -> (i32, i32) {
    %c0_i32 = arith.constant 0 : i32
    %c0_i32_0 = arith.constant 0 : i32
    %c0_i32_1 = arith.constant 0 : i32
    return %c0_i32, %c0_i32_0 : i32, i32
  }
  func.func @transform_3(%arg0: i32) -> (i32, i32) {
    %c0_i32 = arith.constant 0 : i32
    %c0_i32_0 = arith.constant 0 : i32
    return %arg0, %c0_i32 : i32, i32
  }
}

</mosaic_0001>

<bundles_post_ra>
// kernel: tpu_custom_call.1
= control target key start
LH: loop header
LB: loop body
LE: loop exit
PB: predicated region body
PF: predicated region fallthrough
CT: control target
= control target key end

     0   :  { %vm159_vm0 = vcmask 392192   ;;  %s994_s0 = inlined_call_operand.vmem [shape: bf16[256,48], index: 0, kind: input, shape index: {}]   ;;  %s995_s1 = inlined_call_operand.vmem [shape: bf16[48,128], index: 1, kind: input, shape index: {}]   ;;  %s996_s2 = inlined_call_operand.vmem [shape: f32[1,128], index: 2, kind: input, shape index: {}]   ;;  %s997_s3 = inlined_call_operand.hbm [shape: bf16[256,128], index: 3, kind: output, shape index: {}]  }
   0x1   :  { %v806_v0 = vld [vmem:[%s995_s1] sm:$0xff]   ;;  %v807_v1 = vld [vmem:[%s995_s1 + $0x8] sm:$0xff]   ;;  %v808_v2 = vld [vmem:[%s995_s1 + $0x10] sm:$0xff]  }
   0x2   :  { %759 = vmatprep.subr.bf16.mxu0 %v806_v0  ;;  %797 = vmatprep.subr.bf16.mxu1 %v806_v0  ;;  %v809_v3 = vld [vmem:[%s994_s0] sm:$0xff]   ;;  %v811_v5 = vld [vmem:[%s994_s0 + $0x8] sm:$0xff]   ;;  %v813_v7 = vld [vmem:[%s994_s0 + $0x10] sm:$0xff]  }
   0x3   :  { %760 = vmatpush3.bf16.msra.mxu0 %v806_v0  ;;  %800 = vmatpush3.bf16.msra.mxu1 %v806_v0  ;;  %v810_v4 = vld [vmem:[%s994_s0 + $0x40] sm:$0xff]   ;;  %v812_v6 = vld [vmem:[%s994_s0 + $0x48] sm:$0xff]   ;;  %v814_v8 = vld [vmem:[%s994_s0 + $0x50] sm:$0xff]  }
   0x4   :  { %761 = vmatprep.subr.bf16.mxu0 %v807_v1  ;;  %798 = vmatprep.subr.bf16.mxu1 %v807_v1  ;;  %v815_v9 = vld [vmem:[%s994_s0 + $0x18] sm:$0xff]   ;;  %v817_v11 = vld [vmem:[%s994_s0 + $0x20] sm:$0xff]  }
   0x5   :  { %765 = vmatprep.mubr.msk.bf16.mxu0 %vm159_vm0, %v809_v3  ;;  %781 = vmatprep.mubr.msk.bf16.mxu1 %vm159_vm0, %v810_v4  ;;  %v816_v10 = vld [vmem:[%s994_s0 + $0x58] sm:$0xff]   ;;  %v818_v12 = vld [vmem:[%s994_s0 + $0x60] sm:$0xff]  }
   0x7   :  { %762 = vmatpush3.bf16.msra.mxu0 %v807_v1  ;;  %801 = vmatpush3.bf16.msra.mxu1 %v807_v1 }
   0x8   :  { %763 = vmatprep.subr.bf16.mxu0 %v808_v2  ;;  %799 = vmatprep.subr.bf16.mxu1 %v808_v2 }
   0xb   :  { %764 = vmatpush3.bf16.msra.mxu0 %v808_v2  ;;  %802 = vmatpush3.bf16.msra.mxu1 %v808_v2 }
   0xe   :  { %766 = vmatmul.mubr.msk.bf16.vlgmr.msra.gmra.mrb[0].mxu0 %vm159_vm0, %v811_v5  ;;  %782 = vmatmul.mubr.msk.bf16.vlgmr.msra.gmra.mrb[0].mxu1 %vm159_vm0, %v812_v6 }
   0xf   :  { %769 = vmatprep.mubr.msk.bf16.mxu0 %vm159_vm0, %v813_v7  ;;  %785 = vmatprep.mubr.msk.bf16.mxu1 %vm159_vm0, %v814_v8 }
  0x10   :  { %8 = vsyncpa [#allocation3], 0  ;;  %v819_v13 = vld [vmem:[%s994_s0 + $0x28] sm:$0xff]   ;;  %v821_v15 = vld [vmem:[%s994_s0 + $0x30] sm:$0xff]  }
  0x11   :  { %v820_v14 = vld [vmem:[%s994_s0 + $0x68] sm:$0xff]   ;;  %v822_v16 = vld [vmem:[%s994_s0 + $0x70] sm:$0xff]   ;;  %v823_v17 = vld [vmem:[%s994_s0 + $0x38] sm:$0xff]  }
  0x12   :  { %v824_v18 = vld [vmem:[%s994_s0 + $0x78] sm:$0xff]   ;;  %v948_v20 = vld [vmem:[%s996_s2] ss:$0 sm:$0xff]  ;;  %s849_s0 = smov [#allocation2]  }
  0x13   :  { %s534_s2 = sshll.u32 %s849_s0, 4  ;;  %s535_s2 = int_to_ptr.vmem [resolvable:$true] %s534_s2 }
  0x14   :  { %s825_s23 = scalar_lea.vmem %s535_s2, 2048  ;;  %p830_p1 = scmp.lt.s32.totalorder %s535_s2, %s535_s2 }
  0x15   :  { %p826_p0 = scmp.ne.s32.totalorder %s535_s2, %s825_s23  ;;  %p831_p2 = scmp.lt.s32.totalorder %s825_s23, %s825_s23 }
  0x16   :  { %770 = vmatmul.mubr.msk.bf16.gmra.mrb[4].mxu0 %vm159_vm0, %v815_v9  ;;  %786 = vmatmul.mubr.msk.bf16.gmra.mrb[4].mxu1 %vm159_vm0, %v816_v10 }
  0x17   :  { %773 = vmatprep.mubr.msk.bf16.mxu0 %vm159_vm0, %v817_v11  ;;  %789 = vmatprep.mubr.msk.bf16.mxu1 %vm159_vm0, %v818_v12  ;;  %p832_p3 = por %p831_p2, %p830_p1 }
  0x19   :  { %p833_p4 = pnand %p832_p3, %p826_p0 }
  0x1e   :  { %774 = vmatmul.mubr.msk.bf16.gmra.mrb[8].mxu0 %vm159_vm0, %v819_v13  ;;  %790 = vmatmul.mubr.msk.bf16.gmra.mrb[8].mxu1 %vm159_vm0, %v820_v14 }
  0x1f   :  { %777 = vmatprep.mubr.msk.bf16.mxu0 %vm159_vm0, %v821_v15  ;;  %793 = vmatprep.mubr.msk.bf16.mxu1 %vm159_vm0, %v822_v16 }
  0x26   :  { %778 = vmatmul.mubr.msk.bf16.gmra.mrb[12].mxu0 %vm159_vm0, %v823_v17  ;;  %794 = vmatmul.mubr.msk.bf16.gmra.mrb[12].mxu1 %vm159_vm0, %v824_v18 }
  0xe1   :  { %v767_v19 = vpop.f32.mrb[0].mxu0  ;;  %v783_v21 = vpop.f32.mrb[0].mxu1 }
  0xe2   :  { %v242_v22 = vpop.f32.mrb[1].mxu0  ;;  %v306_v23 = vpop.f32.mrb[1].mxu1  ;;  %v251_v26 = vadd.f32 %v767_v19, %v948_v20  ;;  %v315_v27 = vadd.f32 %v783_v21, %v948_v20 }
  0xe3   :  { %v768_v24 = vpop.f32.mrb[2].mxu0  ;;  %v784_v25 = vpop.f32.mrb[2].mxu1  ;;  %v243_v32 = vadd.f32 %v948_v20, %v242_v22  ;;  %v307_v33 = vadd.f32 %v948_v20, %v306_v23 }
  0xe4   :  { %v254_v28 = vadd.f32 %v768_v24, %v948_v20  ;;  %v318_v29 = vadd.f32 %v784_v25, %v948_v20  ;;  %v245_v30 = vpop.f32.mrb[3].mxu0  ;;  %v309_v31 = vpop.f32.mrb[3].mxu1 }
  0xe5   :  { %v246_v34 = vadd.f32 %v948_v20, %v245_v30  ;;  %v310_v35 = vadd.f32 %v948_v20, %v309_v31 }
  0xe6   :  { %v653_v36 = vpack.c.bf16 %v254_v28, %v251_v26  ;;  %v693_v37 = vpack.c.bf16 %v318_v29, %v315_v27 }
  0xe7   :  { %v648_v38 = vpack.c.bf16 %v246_v34, %v243_v32  ;;  %v688_v39 = vpack.c.bf16 %v310_v35, %v307_v33 }
  0xe8   :  { %725 = vst [vmem:[#allocation2 + $0x8] sm:$0xff] %v653_v36   ;;  %733 = vst [vmem:[#allocation2 + $0x48] sm:$0xff] %v693_v37  }
  0xe9   :  { %649 = vst [vmem:[#allocation2] sm:$0xff] %v648_v38   ;;  %732 = vst [vmem:[#allocation2 + $0x40] sm:$0xff] %v688_v39   ;;  %v771_v40 = vpop.f32.mrb[4].mxu0  ;;  %v787_v41 = vpop.f32.mrb[4].mxu1 }
  0xea   :  { %v258_v42 = vpop.f32.mrb[5].mxu0  ;;  %v322_v43 = vpop.f32.mrb[5].mxu1  ;;  %v267_v46 = vadd.f32 %v771_v40, %v948_v20  ;;  %v331_v47 = vadd.f32 %v787_v41, %v948_v20 }
  0xeb   :  { %v772_v44 = vpop.f32.mrb[6].mxu0  ;;  %v788_v45 = vpop.f32.mrb[6].mxu1  ;;  %v259_v52 = vadd.f32 %v948_v20, %v258_v42  ;;  %v323_v53 = vadd.f32 %v948_v20, %v322_v43 }
  0xec   :  { %v270_v48 = vadd.f32 %v772_v44, %v948_v20  ;;  %v334_v49 = vadd.f32 %v788_v45, %v948_v20  ;;  %v261_v50 = vpop.f32.mrb[7].mxu0  ;;  %v325_v51 = vpop.f32.mrb[7].mxu1 }
  0xed   :  { %v262_v54 = vadd.f32 %v948_v20, %v261_v50  ;;  %v326_v55 = vadd.f32 %v948_v20, %v325_v51 }
  0xee   :  { %v663_v56 = vpack.c.bf16 %v270_v48, %v267_v46  ;;  %v703_v57 = vpack.c.bf16 %v334_v49, %v331_v47 }
  0xef   :  { %v658_v58 = vpack.c.bf16 %v262_v54, %v259_v52  ;;  %v698_v59 = vpack.c.bf16 %v326_v55, %v323_v53 }
  0xf0   :  { %727 = vst [vmem:[#allocation2 + $0x18] sm:$0xff] %v663_v56   ;;  %735 = vst [vmem:[#allocation2 + $0x58] sm:$0xff] %v703_v57  }
  0xf1   :  { %726 = vst [vmem:[#allocation2 + $0x10] sm:$0xff] %v658_v58   ;;  %734 = vst [vmem:[#allocation2 + $0x50] sm:$0xff] %v698_v59   ;;  %v775_v60 = vpop.f32.mrb[8].mxu0  ;;  %v791_v61 = vpop.f32.mrb[8].mxu1 }
  0xf2   :  { %v274_v62 = vpop.f32.mrb[9].mxu0  ;;  %v338_v63 = vpop.f32.mrb[9].mxu1  ;;  %v283_v2 = vadd.f32 %v775_v60, %v948_v20  ;;  %v347_v3 = vadd.f32 %v791_v61, %v948_v20 }
  0xf3   :  { %v776_v0 = vpop.f32.mrb[10].mxu0  ;;  %v792_v1 = vpop.f32.mrb[10].mxu1  ;;  %v275_v8 = vadd.f32 %v948_v20, %v274_v62  ;;  %v339_v9 = vadd.f32 %v948_v20, %v338_v63 }
  0xf4   :  { %v286_v4 = vadd.f32 %v776_v0, %v948_v20  ;;  %v350_v5 = vadd.f32 %v792_v1, %v948_v20  ;;  %v277_v6 = vpop.f32.mrb[11].mxu0  ;;  %v341_v7 = vpop.f32.mrb[11].mxu1 }
  0xf5   :  { %v278_v10 = vadd.f32 %v948_v20, %v277_v6  ;;  %v342_v11 = vadd.f32 %v948_v20, %v341_v7 }
  0xf6   :  { %v673_v12 = vpack.c.bf16 %v286_v4, %v283_v2  ;;  %v713_v13 = vpack.c.bf16 %v350_v5, %v347_v3 }
  0xf7   :  { %v668_v14 = vpack.c.bf16 %v278_v10, %v275_v8  ;;  %v708_v15 = vpack.c.bf16 %v342_v11, %v339_v9 }
  0xf8   :  { %729 = vst [vmem:[#allocation2 + $0x28] sm:$0xff] %v673_v12   ;;  %737 = vst [vmem:[#allocation2 + $0x68] sm:$0xff] %v713_v13  }
  0xf9   :  { %728 = vst [vmem:[#allocation2 + $0x20] sm:$0xff] %v668_v14   ;;  %736 = vst [vmem:[#allocation2 + $0x60] sm:$0xff] %v708_v15   ;;  %v779_v16 = vpop.f32.mrb[12].mxu0  ;;  %v795_v17 = vpop.f32.mrb[12].mxu1 }
  0xfa   :  { %v290_v18 = vpop.f32.mrb[13].mxu0  ;;  %v354_v19 = vpop.f32.mrb[13].mxu1  ;;  %v299_v23 = vadd.f32 %v779_v16, %v948_v20  ;;  %v363_v24 = vadd.f32 %v795_v17, %v948_v20 }
  0xfb   :  { %v780_v21 = vpop.f32.mrb[14].mxu0  ;;  %v796_v22 = vpop.f32.mrb[14].mxu1  ;;  %v291_v29 = vadd.f32 %v948_v20, %v290_v18  ;;  %v355_v30 = vadd.f32 %v948_v20, %v354_v19 }
  0xfc   :  { %v302_v25 = vadd.f32 %v780_v21, %v948_v20  ;;  %v366_v26 = vadd.f32 %v796_v22, %v948_v20  ;;  %v293_v27 = vpop.f32.mrb[15].mxu0  ;;  %v357_v28 = vpop.f32.mrb[15].mxu1 }
  0xfd   :  { %v294_v31 = vadd.f32 %v948_v20, %v293_v27  ;;  %v358_v32 = vadd.f32 %v948_v20, %v357_v28 }
  0xfe   :  { %v683_v33 = vpack.c.bf16 %v302_v25, %v299_v23  ;;  %v723_v34 = vpack.c.bf16 %v366_v26, %v363_v24 }
  0xff   :  { %v678_v35 = vpack.c.bf16 %v294_v31, %v291_v29  ;;  %v718_v36 = vpack.c.bf16 %v358_v32, %v355_v30 }
 0x100   :  { %731 = vst [vmem:[#allocation2 + $0x38] sm:$0xff] %v683_v33   ;;  %739 = vst [vmem:[#allocation2 + $0x78] sm:$0xff] %v723_v34  }
 0x101   :  { %730 = vst [vmem:[#allocation2 + $0x30] sm:$0xff] %v678_v35   ;;  %738 = vst [vmem:[#allocation2 + $0x70] sm:$0xff] %v718_v36  }
 0x102   :  { %836 = shalt.err (!%p833_p4)
}
 0x103   :  { %s837_s26 = scalar_lea.hbm %s997_s3, 2048 }
 0x104   :  { %p838_p5 = scmp.ne.s32.totalorder %s997_s3, %s837_s26  ;;  %p841_p6 = scmp.lt.u32.totalorder %s837_s26, %s997_s3 }
 0x106   :  { %p843_p7 = pnand %p841_p6, %p838_p5 }
 0x108   :  { %846 = shalt.err (!%p843_p7)
}
 0x109   :  { %s850_s4 = smov 64   ;;  %s851_s5 = smov 4  }
 0x10a   :  { %540 = dma.vmem_to_hbm [thread:$0]  %s535_s2, 2048, %s997_s3, [#allocation3], %s850_s4, %s850_s4, %s851_s5  }
 0x10b   :  { %847 = dma.done.wait [#allocation3], 2048  }
 0x10c   :  { %848 = vsyncadd [#allocation3], 4294965248 }
 0x10d   :  { %544 = vsyncpa [#allocation3], 1 }

</bundles_post_ra>
